<compile_context>
chip_gen: v7x
topology: tpu7x:2x2x1
jax: 0.10.0
libtpu: 0.0.40
codegen_flags: <defaults>
</compile_context>

<pallas_src>
import jax
import jax.numpy as jnp
from jax.experimental import pallas as pl
from jax.experimental.pallas import tpu as pltpu


_INV_SQRT2 = 0.7071067811865476
_A = 0.3139
_HALF_B = 0.5 * 0.5431  # 0.27155


def _fvit5_math(x_f32):
    # 0.3139*x^2 + 0.5431 * 0.5*x*(1 + erf(x/sqrt(2)))
    #   = x * (0.3139*x + 0.27155 + 0.27155*erf(x/sqrt(2)))
    return x_f32 * (_A * x_f32 + _HALF_B + _HALF_B * jax.lax.erf(x_f32 * _INV_SQRT2))


def _fvit5_kernel(x_ref, o_ref):
    x = x_ref[...].astype(jnp.float32)
    o_ref[...] = _fvit5_math(x).astype(o_ref.dtype)


def _cdiv(a, b):
    return -(-a // b)


def _round_up(a, b):
    return _cdiv(a, b) * b


_TINY_N = 64 * 1024  # below this, XLA fuses the elementwise chain cheaper than Pallas dispatch


def fvit5(x):
    """Elementwise: 0.3139 * x^2 + 0.5431 * GELU(x). Shape/dtype preserving."""
    orig_shape = x.shape
    dtype = x.dtype
    n = x.size

    # Tiny-input fallback: Pallas dispatch/grid-setup overhead dominates here.
    if n < _TINY_N:
        return _fvit5_math(x.astype(jnp.float32)).astype(dtype)

    itemsize = jnp.dtype(dtype).itemsize
    sublane = {4: 8, 2: 16, 1: 32}.get(itemsize, 8)
    x_flat = jnp.ravel(x)  # metadata-only for contiguous inputs

    # Widest lane count (multiple of 128) that divides n exactly -> zero-copy 2-D view.
    lanes = 0
    for w in (2048, 1024, 512, 256, 128):
        if n % w == 0:
            lanes = w
            break

    if lanes:
        # --- common ViT-activation path: lane-dense (rows, lanes) slab, zero copies ---
        rows = n // lanes
        target_bytes = 4 << 20  # ~4 MiB blocks amortize the ~0.35 us/grid-step overhead
        max_block_rows = max(
            sublane, ((target_bytes // (lanes * itemsize)) // sublane) * sublane
        )
        # Aim for >= 4-8 grid steps so input+output DMA double-buffering reaches
        # steady state and both v7x TensorCores get >= 2 programs each.
        desired_steps = 8 if n * itemsize >= (4 << 20) else 4
        rows_per_step = max(sublane, _round_up(_cdiv(rows, desired_steps), sublane))
        block_rows = min(max_block_rows, rows_per_step)
        steps = _cdiv(rows, block_rows)
        # Prefer an even grid so the two v7x TCs split evenly under "parallel".
        if steps > 1 and steps % 2 == 1:
            alt = max(sublane, _round_up(_cdiv(rows, steps + 1), sublane))
            if _cdiv(rows, alt) % 2 == 0:
                block_rows = alt
                steps = _cdiv(rows, block_rows)
        x2d = x_flat.reshape(rows, lanes)
        block_shape = (block_rows, lanes)
        index_map = lambda i: (i, 0)
        grid = (steps,)
    else:
        # --- rare non-128-divisible path: zero-copy (1, n) view, tail block is
        # automatically padded on read and masked on write (no jnp.pad / slice). ---
        # Padded VMEM footprint of a (1, L) block is 8*L*itemsize; target ~4 MiB.
        lane_block = max(128, (((4 << 20) // (8 * itemsize)) // 128) * 128)
        x2d = x_flat.reshape(1, n)
        block_shape = (1, lane_block)
        index_map = lambda i: (0, i)
        grid = (_cdiv(n, lane_block),)

    # Hard cap well inside v7x's 64 MiB physical VMEM (and harmless on v5e/v6e).
    vmem_limit = 32 << 20

    cost = pl.CostEstimate(
        flops=10 * n,
        transcendentals=n,  # one erf per element
        bytes_accessed=2 * n * itemsize,
    )

    out2d = pl.pallas_call(
        _fvit5_kernel,
        out_shape=jax.ShapeDtypeStruct(x2d.shape, dtype),
        grid_spec=pltpu.PrefetchScalarGridSpec(
            num_scalar_prefetch=0,
            grid=grid,
            in_specs=[pl.BlockSpec(block_shape, index_map)],
            out_specs=pl.BlockSpec(block_shape, index_map),
        ),
        compiler_params=pltpu.CompilerParams(
            dimension_semantics=("parallel",),
            vmem_limit_bytes=vmem_limit,
        ),
        cost_estimate=cost,
    )(x2d)

    return out2d.reshape(orig_shape)


def fvit5_ref(x):
    xf = x.astype(jnp.float32)
    return (0.3139 * xf * xf + 0.5431 * jax.nn.gelu(xf, approximate=False)).astype(x.dtype)


if __name__ == "__main__":
    # Small NCHW input consistent with TinyViT usage -> fused-XLA fallback path.
    x0 = jax.random.normal(jax.random.PRNGKey(0), (2, 4, 16, 16), dtype=jnp.float32)
    y0 = fvit5(x0)
    jax.block_until_ready(y0)
    assert y0.shape == x0.shape and y0.dtype == x0.dtype
    assert jnp.allclose(y0, fvit5_ref(x0), atol=1e-5, rtol=1e-5)

    # Larger activation -> lane-dense multi-block Pallas path (divisible by 128).
    x1 = jax.random.normal(jax.random.PRNGKey(1), (2, 64, 32, 32), dtype=jnp.float32)
    y1 = fvit5(x1)
    jax.block_until_ready(y1)
    assert y1.shape == x1.shape
    assert jnp.allclose(y1, fvit5_ref(x1), atol=1e-5, rtol=1e-5)

    # bf16 input through the Pallas path (f32 internal compute, bf16 I/O).
    x2 = jax.random.normal(jax.random.PRNGKey(2), (2, 64, 32, 32), dtype=jnp.bfloat16)
    y2 = fvit5(x2)
    jax.block_until_ready(y2)
    assert y2.dtype == jnp.bfloat16
    assert jnp.allclose(
        y2.astype(jnp.float32), fvit5_ref(x2).astype(jnp.float32), atol=5e-2, rtol=5e-2
    )

    # Odd, non-128-divisible element count -> zero-copy (1, n) tail-masked path.
    x3 = jax.random.normal(jax.random.PRNGKey(3), (6, 7, 61, 53), dtype=jnp.float32)
    y3 = fvit5(x3)
    jax.block_until_ready(y3)
    assert y3.shape == x3.shape
    assert jnp.allclose(y3, fvit5_ref(x3), atol=1e-5, rtol=1e-5)

    print("KERNEL_OK")
</pallas_src>

<mosaic_0001>
module attributes {stable_mosaic.version = 11 : i64} {
  func.func @_fvit5_kernel(%arg0: i32, %arg1: memref<16x2048xf32, #tpu.memory_space<vmem>>, %arg2: memref<16x2048xf32, #tpu.memory_space<vmem>>) attributes {dimension_semantics = [#tpu.dimension_semantics<parallel>], iteration_bounds = array<i64: 4>, scalar_prefetch = 0 : i64, scratch_operands = 0 : i64, tpu.core_type = #tpu.core_type<tc>, window_params = [{transform_indices = @transform_0, window_bounds = array<i64: 16, 2048>}, {transform_indices = @transform_1, window_bounds = array<i64: 16, 2048>}]} {
    %c0 = arith.constant 0 : index
    %c0_0 = arith.constant 0 : index
    %0 = vector.load %arg1[%c0, %c0_0] : memref<16x2048xf32, #tpu.memory_space<vmem>>, vector<16x2048xf32>
    %cst = arith.constant 3.139000e-01 : f32
    %1 = vector.broadcast %cst : f32 to vector<16x2048xf32>
    %2 = arith.mulf %1, %0 : vector<16x2048xf32>
    %cst_1 = arith.constant 2.715500e-01 : f32
    %3 = vector.broadcast %cst_1 : f32 to vector<16x2048xf32>
    %4 = arith.addf %2, %3 : vector<16x2048xf32>
    %cst_2 = arith.constant 0.707106769 : f32
    %5 = vector.broadcast %cst_2 : f32 to vector<16x2048xf32>
    %6 = arith.mulf %0, %5 : vector<16x2048xf32>
    %7 = math.erf %6 : vector<16x2048xf32>
    %cst_3 = arith.constant 2.715500e-01 : f32
    %8 = vector.broadcast %cst_3 : f32 to vector<16x2048xf32>
    %9 = arith.mulf %8, %7 : vector<16x2048xf32>
    %10 = arith.addf %4, %9 : vector<16x2048xf32>
    %11 = arith.mulf %0, %10 : vector<16x2048xf32>
    %c0_4 = arith.constant 0 : index
    %c0_5 = arith.constant 0 : index
    %12 = vector.load %arg2[%c0_4, %c0_5] : memref<16x2048xf32, #tpu.memory_space<vmem>>, vector<16x2048xf32>
    tpu.vector_store %arg2[%c0_4, %c0_5], %11 {strides = array<i32>} : memref<16x2048xf32, #tpu.memory_space<vmem>>, vector<16x2048xf32>,
    return
  }
  func.func @transform_0(%arg0: i32) -> (i32, i32) {
    %c0_i32 = arith.constant 0 : i32
    %c0_i32_0 = arith.constant 0 : i32
    return %arg0, %c0_i32 : i32, i32
  }
  func.func @transform_1(%arg0: i32) -> (i32, i32) {
    %c0_i32 = arith.constant 0 : i32
    %c0_i32_0 = arith.constant 0 : i32
    return %arg0, %c0_i32 : i32, i32
  }
}

</mosaic_0001>

<bundles_post_ra>
// kernel: tpu_custom_call.1
= control target key start
LH: loop header
LB: loop body
LE: loop exit
PB: predicated region body
PF: predicated region fallthrough
CT: control target
= control target key end

     0   :  { %6 = vsyncpa [#allocation3], 0  ;;  %s1158_s0 = inlined_call_operand.hbm [shape: f32[64,2048], index: 0, kind: input, shape index: {}]   ;;  %s1159_s1 = inlined_call_operand.hbm [shape: f32[64,2048], index: 1, kind: output, shape index: {}]  }
   0x1   :  { %8 = vsyncpa [#allocation3 + $0x1], 0 }
   0x2   :  { %9 = vsyncpa [#allocation4], 0 }
   0x3   :  { %11 = vsyncpa [#allocation4 + $0x1], 0  ;;  %s762_s6 = smov 0   ;;  %s764_s7 = smov 0  }
   0x4   :  { %s766_s8 = smov 0   ;;  %s768_s9 = smov 0  }
   0x5 LB: > { %s783_s10 = sadd.s32 4294967295, %s744_s9   ;;  %s514_s11 = sadd.s32 4294967294, %s744_s9   ;;  %s744_s9 = sphi %s768_s9, %s1171_s9   ;;  %s740_s8 = sphi %s766_s8, %s1170_s8   ;;  %s736_s7 = sphi %s764_s7, %s1169_s7   ;;  %s732_s6 = sphi %s762_s6, %s1168_s6  }
   0x6   : > { %s787_s12 = sadd.s32 1, %s744_s9   ;;  %s24_s13 = sadd.s32 1, %s740_s8 }
   0x7   : > { %s21_s14 = ssub.s32 %s744_s9, %s787_s12  ;;  %p31_p0 = scmp.ne.s32.totalorder %s740_s8, %s736_s7 }
   0x8   : > { %p22_p1 = scmp.eq.s32.totalorder %s21_s14, 0  ;;  %p32_p2 = scmp.eq.s32.totalorder %s744_s9, 0 }
   0x9   : > { %p37_p3 = scmp.ne.s32.totalorder %s736_s7, %s732_s6  ;;  %p38_p4 = scmp.eq.s32.totalorder %s783_s10, 0 }
   0xa   : > { %s799_s15 = scalar_select %p22_p1, %s740_s8, %s24_s13  }
   0xb   : > { %p801_p5 = por %p32_p2, %p31_p0  ;;  %p805_p6 = por %p38_p4, %p37_p3 }
   0xc   : > { %p61_p7 = scmp.eq.s32.totalorder %s783_s10, 3  ;;  %p67_p8 = scmp.eq.s32.totalorder %s514_s11, 3 }
   0xd   : > { %p546_p9 = scmp.lt.s32.totalorder %s744_s9, 4  ;;  %s87_s20 = sand.u32 1, %s740_s8  }
   0xe   : > { %p811_p10 = por %p61_p7, %p31_p0  ;;  %p815_p11 = por %p67_p8, %p37_p3 }
   0xf   : > { %s531_s21 = sshll.u32 %s744_s9, 12  ;;  %s517_s22 = sshll.u32 %s87_s20, 8 }
  0x10   : > { %s1163_s18 = scalar_select %p811_p10, 1, 0 }
  0x11   : > { %s1164_s19 = scalar_select %p815_p11, 1, 0 }
  0x12   : > { %s824_s25 = scalar_lea.hbm %s1158_s0, %s531_s21  ;;  %s91_s26 = scalar_lea.vmem [#allocation2], %s517_s22 }
  0x13   : > { %s99_s27 = sshll.u32 %s91_s26, 4  ;;  %p828_p12 = pnand %p546_p9, %p801_p5  ;;  %s832_s27 = int_to_ptr.vmem [resolvable:$true] %s99_s27 }
  0x14   : > { %s834_s29 = scalar_lea.sflag [#allocation3], %s87_s20  ;;  %s648_s30 = scalar_lea.hbm %s824_s25, 4096 }
  0x15   : > { %p649_p13 = scmp.ne.s32.totalorder %s824_s25, %s648_s30  ;;  %p650_p0 = pneg %p828_p12 }
  0x16   : > { %s653_s4 = scalar_lea.hbm %s1158_s0, 16384  ;;  %p654_p3 = scmp.lt.u32.totalorder %s824_s25, %s1158_s0 }
  0x17   : > { %p651_p1 = pnand %p650_p0, %p649_p13  ;;  %p655_p4 = scmp.lt.u32.totalorder %s653_s4, %s648_s30 }
  0x18   : > { %p657_p7 = scmp.lt.u32.totalorder %s648_s30, %s824_s25 }
  0x19   : > { %p652_p2 = pneg %p651_p1  ;;  %p656_p5 = por %p655_p4, %p654_p3 }
  0x1b   : > { %p658_p8 = por %p657_p7, %p656_p5 }
  0x1d   : > { %p659_p9 = pnand %p658_p8, %p652_p2 }
  0x1f   : > { %662 = shalt.err (!%p659_p9)
}
  0x20   : > { %s663_s13 = scalar_lea.vmem %s832_s27, 4096  ;;  %s746_s14 = smov [#allocation2]  }
  0x21   : > { %p664_p13 = scmp.ne.s32.totalorder %s832_s27, %s663_s13  ;;  %s668_s16 = sshll.u32 %s746_s14, 4  ;;  %s669_s16 = int_to_ptr.vmem [resolvable:$false] %s668_s16 }
  0x22   : > { %s670_s20 = scalar_lea.vmem %s669_s16, 8192  ;;  %p671_p10 = scmp.lt.s32.totalorder %s832_s27, %s669_s16 }
  0x23   : > { %p666_p1 = pnand %p664_p13, %p650_p0  ;;  %p672_p3 = scmp.lt.s32.totalorder %s670_s20, %s663_s13 }
  0x25   : > { %p667_p11 = pneg %p666_p1  ;;  %p673_p4 = por %p672_p3, %p671_p10 }
  0x27   : > { %p674_p5 = pnand %p673_p4, %p667_p11 }
  0x29   : > { %677 = shalt.err (!%p674_p5)
}
  0x2a   : > { %s747_s21 = smov 2048   ;;  %s748_s22 = smov 128  }
  0x2b   : > { %541 = dma.hbm_to_vmem [thread:$0]  (!%p828_p12), %s824_s25, 4096, %s832_s27, %s834_s29, %s747_s21, %s747_s21, %s748_s22  }
  0x2c   : > { %p521_p0 = scmp.ge.s32.totalorder %s744_s9, 1  ;;  %p107_p2 = scmp.lt.s32.totalorder %s744_s9, 5 }
  0x2e   : > { %p108_p7 = pnand %p521_p0, %p107_p2 }
  0x2f   : > { %s865_s23 = sand.u32 (!%p108_p7), 1, %s736_s7  }
  0x30   : > { %111 = sbr.rel (%p108_p7) target bundleno = 142 (0x8e), region = 24  ;;  %s522_s24 = sshll.u32 (!%p108_p7), %s865_s23, 8 }
  0x31   : > { %s114_s26 = scalar_lea.sflag (!%p108_p7), [#allocation3], %s865_s23  ;;  %s871_s30 = scalar_lea.vmem (!%p108_p7), [#allocation2], %s522_s24 }
  0x37   : > { %723 = dma.done.wait (%p805_p6), %s114_s26, 4096  }
  0x38   : > { %725 = vsyncadd (%p805_p6), %s114_s26, 4294963200  ;;  %v878_v0 = vld [vmem:[%s871_s30] sm:$0xff]  ;;  %v881_v1 = vld [vmem:[%s871_s30 + $0x8] sm:$0xff]  ;;  %s953_s17 = scalar_lea.vmem [#allocation5], %s522_s24  ;;  %s533_s25 = sshll.u32 %s783_s10, 12 }
  0x39   : > { %v884_v2 = vld [vmem:[%s871_s30 + $0x10] sm:$0xff]  ;;  %v170_v3 = vmul.f32 0.3139, %v878_v0  ;;  %v234_v4 = vmul.f32 0.70710677, %v878_v0  ;;  %v892_v8 = vld [vmem:[%s871_s30 + $0x18] sm:$0xff]  ;;  %s1111_s2 = scalar_lea.hbm %s1159_s1, %s533_s25 }
  0x3a   : > { %v171_v5 = vmul.f32 0.3139, %v881_v1  ;;  %v235_v6 = vmul.f32 0.70710677, %v881_v1  ;;  %v236_v7 = vmul.f32 0.70710677, %v884_v2 }
  0x3b   : > { %584 = verf.f32 %v234_v4  ;;  %v895_v9 = vld [vmem:[%s871_s30 + $0x20] sm:$0xff]  ;;  %v237_v10 = vmul.f32 0.70710677, %v892_v8  ;;  %v172_v11 = vmul.f32 0.3139, %v884_v2  ;;  %v901_v13 = vld [vmem:[%s871_s30 + $0x28] sm:$0xff] }
  0x3c   : > { %586 = verf.f32 %v235_v6  ;;  %v238_v12 = vmul.f32 0.70710677, %v895_v9  ;;  %v904_v14 = vld [vmem:[%s871_s30 + $0x30] sm:$0xff]  ;;  %v202_v15 = vadd.f32 0.27155, %v170_v3  ;;  %v912_v22 = vld [vmem:[%s871_s30 + $0x38] sm:$0xff] }
  0x3d   : > { %588 = verf.f32 %v236_v7  ;;  %v203_v16 = vadd.f32 0.27155, %v171_v5  ;;  %v239_v17 = vmul.f32 0.70710677, %v901_v13  ;;  %v173_v18 = vmul.f32 0.3139, %v892_v8 }
  0x3e   : > { %590 = verf.f32 %v237_v10  ;;  %v174_v19 = vmul.f32 0.3139, %v895_v9  ;;  %v240_v20 = vmul.f32 0.70710677, %v904_v14  ;;  %v175_v21 = vmul.f32 0.3139, %v901_v13 }
  0x3f   : > { %592 = verf.f32 %v238_v12  ;;  %v915_v23 = vld [vmem:[%s871_s30 + $0x40] sm:$0xff]  ;;  %v918_v24 = vld [vmem:[%s871_s30 + $0x48] sm:$0xff]  ;;  %v204_v25 = vadd.f32 0.27155, %v172_v11  ;;  %v176_v26 = vmul.f32 0.3139, %v904_v14 }
  0x40   : > { %594 = verf.f32 %v239_v17  ;;  %v241_v27 = vmul.f32 0.70710677, %v912_v22  ;;  %v177_v28 = vmul.f32 0.3139, %v912_v22  ;;  %v178_v29 = vmul.f32 0.3139, %v915_v23 }
  0x41   : > { %596 = verf.f32 %v240_v20  ;;  %v242_v30 = vmul.f32 0.70710677, %v915_v23  ;;  %v179_v31 = vmul.f32 0.3139, %v918_v24  ;;  %v243_v32 = vmul.f32 0.70710677, %v918_v24 }
  0x42   : > { %598 = verf.f32 %v241_v27  ;;  %v928_v33 = vld [vmem:[%s871_s30 + $0x50] sm:$0xff]  ;;  %v931_v34 = vld [vmem:[%s871_s30 + $0x58] sm:$0xff]  ;;  %v205_v35 = vadd.f32 0.27155, %v173_v18  ;;  %v206_v36 = vadd.f32 0.27155, %v174_v19 }
  0x43   : > { %v207_v37 = vadd.f32 0.27155, %v175_v21  ;;  %600 = verf.f32 %v242_v30  ;;  %v208_v39 = vadd.f32 0.27155, %v176_v26  ;;  %v244_v40 = vmul.f32 0.70710677, %v928_v33 }
  0x44   : > { %602 = verf.f32 %v243_v32  ;;  %v245_v41 = vmul.f32 0.70710677, %v931_v34  ;;  %v209_v44 = vadd.f32 0.27155, %v177_v28  ;;  %v936_v45 = vld [vmem:[%s871_s30 + $0x60] sm:$0xff]  ;;  %v943_v58 = vld [vmem:[%s871_s30 + $0x68] sm:$0xff] }
  0x45   : > { %v585_v38 = vpop.eup %584  ;;  %v210_v48 = vadd.f32 0.27155, %v178_v29  ;;  %v938_v49 = vadd.f32 0.27155, %v179_v31  ;;  %604 = verf.f32 %v244_v40  ;;  %v246_v53 = vmul.f32 0.70710677, %v936_v45 }
  0x46   : > { %v587_v42 = vpop.eup %586  ;;  %v298_v43 = vmul.f32 0.27155, %v585_v38  ;;  %606 = verf.f32 %v245_v41  ;;  %v180_v57 = vmul.f32 0.3139, %v928_v33  ;;  %v947_v63 = vld [vmem:[%s871_s30 + $0x70] sm:$0xff]  ;;  %v968_v26 = vld [vmem:[%s871_s30 + $0x80] sm:$0xff] }
  0x47   : > { %v589_v46 = vpop.eup %588  ;;  %v299_v47 = vmul.f32 0.27155, %v587_v42  ;;  %608 = verf.f32 %v246_v53  ;;  %v181_v7 = vmul.f32 0.3139, %v931_v34  ;;  %v247_v12 = vmul.f32 0.70710677, %v943_v58 }
  0x48   : > { %v591_v50 = vpop.eup %590  ;;  %v330_v51 = vadd.f32 %v298_v43, %v202_v15  ;;  %v300_v52 = vmul.f32 0.27155, %v589_v46  ;;  %v182_v17 = vmul.f32 0.3139, %v936_v45  ;;  %v248_v18 = vmul.f32 0.70710677, %v947_v63 }
  0x49   : > { %v593_v54 = vpop.eup %592  ;;  %v331_v55 = vadd.f32 %v299_v47, %v203_v16  ;;  %v301_v56 = vmul.f32 0.27155, %v591_v50  ;;  %610 = verf.f32 %v247_v12  ;;  %v183_v29 = vmul.f32 0.3139, %v943_v58  ;;  %v982_v43 = vld [vmem:[%s871_s30 + $0x88] sm:$0xff]  ;;  %s441_s27 = sshll.u32 %s953_s17, 4  ;;  %s1113_s27 = int_to_ptr.vmem [resolvable:$true] %s441_s27 }
  0x4a   : > { %v595_v59 = vpop.eup %594  ;;  %v362_v60 = vmul.f32 %v330_v51, %v878_v0  ;;  %v332_v61 = vadd.f32 %v300_v52, %v204_v25  ;;  %v302_v62 = vmul.f32 0.27155, %v593_v54  ;;  %v965_v25 = vld [vmem:[%s871_s30 + $0x78] sm:$0xff]  ;;  %612 = verf.f32 %v248_v18  ;;  %s427_s10 = scalar_lea.sflag [#allocation4], %s865_s23  ;;  %s678_s3 = scalar_lea.vmem %s1113_s27, 4096 }
  0x4b   : > { %v597_v3 = vpop.eup %596  ;;  %v363_v4 = vmul.f32 %v331_v55, %v881_v1  ;;  %v333_v5 = vadd.f32 %v301_v56, %v205_v35  ;;  %v303_v6 = vmul.f32 0.27155, %v595_v59  ;;  %v212_v32 = vadd.f32 0.27155, %v180_v57  ;;  %v994_v54 = vld [vmem:[%s871_s30 + $0x98] sm:$0xff]  ;;  %v997_v55 = vld [vmem:[%s871_s30 + $0xa0] sm:$0xff]  ;;  %p679_p6 = scmp.ne.s32.totalorder %s1113_s27, %s678_s3 }
  0x4c   : > { %394 = vst [vmem:[%s953_s17] sm:$0xff] %v362_v60  ;;  %v364_v0 = vmul.f32 %v332_v61, %v884_v2  ;;  %v334_v10 = vadd.f32 %v302_v62, %v206_v36  ;;  %v304_v11 = vmul.f32 0.27155, %v597_v3  ;;  %v599_v1 = vpop.eup %598  ;;  %v250_v38 = vmul.f32 0.70710677, %v968_v26  ;;  %v1007_v3 = vld [vmem:[%s871_s30 + $0xa8] sm:$0xff]  ;;  %p1166_p10 = scmp.ne.s32.totalorder %s1163_s18, 0 }
  0x4d   : > { %395 = vst [vmem:[%s953_s17 + $0x8] sm:$0xff] %v363_v4  ;;  %v365_v15 = vmul.f32 %v333_v5, %v892_v8  ;;  %v335_v16 = vadd.f32 %v303_v6, %v207_v37  ;;  %v601_v19 = vpop.eup %600  ;;  %v305_v21 = vmul.f32 0.27155, %v599_v1  ;;  %v213_v37 = vadd.f32 0.27155, %v181_v7  ;;  %v1012_v6 = vld [vmem:[%s871_s30 + $0xb0] sm:$0xff] }
  0x4e   : > { %396 = vst [vmem:[%s953_s17 + $0x10] sm:$0xff] %v364_v0  ;;  %v366_v2 = vmul.f32 %v334_v10, %v895_v9  ;;  %v336_v20 = vadd.f32 %v304_v11, %v208_v39  ;;  %v603_v27 = vpop.eup %602  ;;  %v306_v28 = vmul.f32 0.27155, %v601_v19  ;;  %v214_v42 = vadd.f32 0.27155, %v182_v17  ;;  %v1015_v7 = vld [vmem:[%s871_s30 + $0xb8] sm:$0xff]  ;;  %p680_p11 = pnand %p679_p6, %p1166_p10 }
  0x4f   : > { %397 = vst [vmem:[%s953_s17 + $0x18] sm:$0xff] %v365_v15  ;;  %v367_v8 = vmul.f32 %v335_v16, %v901_v13  ;;  %v337_v30 = vadd.f32 %v305_v21, %v209_v44  ;;  %v307_v31 = vmul.f32 0.27155, %v603_v27  ;;  %v605_v35 = vpop.eup %604  ;;  %v249_v13 = vmul.f32 0.70710677, %v965_v25  ;;  %v1026_v21 = vld [vmem:[%s871_s30 + $0xc0] sm:$0xff] }
  0x50   : > { %398 = vst [vmem:[%s953_s17 + $0x20] sm:$0xff] %v366_v2  ;;  %v368_v9 = vmul.f32 %v336_v20, %v904_v14  ;;  %v338_v36 = vadd.f32 %v306_v28, %v210_v48  ;;  %v607_v39 = vpop.eup %606  ;;  %v308_v41 = vmul.f32 0.27155, %v605_v35  ;;  %v215_v47 = vadd.f32 0.27155, %v183_v29  ;;  %v986_v48 = vld [vmem:[%s871_s30 + $0x90] sm:$0xff]  ;;  %p681_p12 = pneg %p680_p11 }
  0x51   : > { %399 = vst [vmem:[%s953_s17 + $0x28] sm:$0xff] %v367_v8  ;;  %v369_v40 = vmul.f32 %v337_v30, %v912_v22  ;;  %v339_v14 = vadd.f32 %v307_v31, %v938_v49  ;;  %v309_v46 = vmul.f32 0.27155, %v607_v39  ;;  %614 = verf.f32 %v249_v13  ;;  %v609_v50 = vpop.eup %608  ;;  %v1029_v27 = vld [vmem:[%s871_s30 + $0xc8] sm:$0xff]  ;;  %s749_s4 = smov [#allocation5]  }
  0x52   : > { %400 = vst [vmem:[%s953_s17 + $0x30] sm:$0xff] %v368_v9  ;;  %v370_v44 = vmul.f32 %v338_v36, %v915_v23  ;;  %v340_v51 = vadd.f32 %v308_v41, %v212_v32  ;;  %v184_v49 = vmul.f32 0.3139, %v947_v63  ;;  %616 = verf.f32 %v250_v38  ;;  %s682_s5 = sshll.u32 %s749_s4, 4  ;;  %s683_s5 = int_to_ptr.vmem [resolvable:$false] %s682_s5 }
  0x53   : > { %401 = vst [vmem:[%s953_s17 + $0x38] sm:$0xff] %v369_v40  ;;  %v371_v22 = vmul.f32 %v339_v14, %v918_v24  ;;  %v341_v52 = vadd.f32 %v309_v46, %v213_v37  ;;  %v310_v23 = vmul.f32 0.27155, %v609_v50  ;;  %v251_v53 = vmul.f32 0.70710677, %v982_v43  ;;  %v611_v4 = vpop.eup %610  ;;  %v1037_v37 = vld [vmem:[%s871_s30 + $0xd0] sm:$0xff]  ;;  %p685_p8 = scmp.lt.s32.totalorder %s1113_s27, %s683_s5 }
  0x54   : > { %402 = vst [vmem:[%s953_s17 + $0x40] sm:$0xff] %v370_v44  ;;  %v372_v24 = vmul.f32 %v340_v51, %v928_v33  ;;  %v185_v56 = vmul.f32 0.3139, %v965_v25  ;;  %v186_v57 = vmul.f32 0.3139, %v968_v26  ;;  %v613_v0 = vpop.eup %612  ;;  %s684_s11 = scalar_lea.vmem %s683_s5, 8192 }
  0x55   : > { %403 = vst [vmem:[%s953_s17 + $0x48] sm:$0xff] %v371_v22  ;;  %v252_v59 = vmul.f32 0.70710677, %v986_v48  ;;  %v373_v60 = vmul.f32 %v341_v52, %v931_v34  ;;  %v342_v61 = vadd.f32 %v310_v23, %v214_v42  ;;  %v187_v62 = vmul.f32 0.3139, %v982_v43  ;;  %v1051_v52 = vld [vmem:[%s871_s30 + $0xe0] sm:$0xff]  ;;  %p686_p9 = scmp.lt.s32.totalorder %s684_s11, %s678_s3 }
  0x56   : > { %618 = verf.f32 %v251_v53  ;;  %404 = vst [vmem:[%s953_s17 + $0x50] sm:$0xff] %v372_v24  ;;  %v216_v5 = vadd.f32 0.27155, %v184_v49  ;;  %v253_v33 = vmul.f32 0.70710677, %v994_v54 }
  0x57   : > { %620 = verf.f32 %v252_v59  ;;  %405 = vst [vmem:[%s953_s17 + $0x58] sm:$0xff] %v373_v60  ;;  %v374_v34 = vmul.f32 %v342_v61, %v936_v45  ;;  %v311_v10 = vmul.f32 0.27155, %v611_v4  ;;  %v188_v11 = vmul.f32 0.3139, %v986_v48  ;;  %p687_p13 = por %p686_p9, %p685_p8 }
  0x58   : > { %v254_v12 = vmul.f32 0.70710677, %v997_v55  ;;  %v312_v1 = vmul.f32 0.27155, %v613_v0  ;;  %v217_v15 = vadd.f32 0.27155, %v185_v56  ;;  %622 = verf.f32 %v253_v33 }
  0x59   : > { %v255_v16 = vmul.f32 0.70710677, %v1007_v3  ;;  %406 = vst [vmem:[%s953_s17 + $0x60] sm:$0xff] %v374_v34  ;;  %v343_v17 = vadd.f32 %v311_v10, %v215_v47  ;;  %v218_v18 = vadd.f32 0.27155, %v186_v57  ;;  %v1047_v47 = vld [vmem:[%s871_s30 + $0xd8] sm:$0xff]  ;;  %p688_p1 = pnand %p687_p13, %p681_p12 }
  0x5a   : > { %v219_v19 = vadd.f32 0.27155, %v187_v62  ;;  %624 = verf.f32 %v254_v12  ;;  %v344_v2 = vadd.f32 %v312_v1, %v216_v5  ;;  %v189_v45 = vmul.f32 0.3139, %v994_v54  ;;  %v1055_v56 = vld [vmem:[%s871_s30 + $0xe8] sm:$0xff]  ;;  %v1066_v12 = vld [vmem:[%s871_s30 + $0xf0] sm:$0xff] }
  0x5b   : > { %626 = verf.f32 %v255_v16  ;;  %v256_v20 = vmul.f32 0.70710677, %v1012_v6  ;;  %v615_v8 = vpop.eup %614  ;;  %v375_v28 = vmul.f32 %v343_v17, %v943_v58  ;;  %v220_v29 = vadd.f32 0.27155, %v188_v11 }
  0x5c   : > { %v190_v9 = vmul.f32 0.3139, %v997_v55  ;;  %v257_v30 = vmul.f32 0.70710677, %v1015_v7  ;;  %v617_v31 = vpop.eup %616  ;;  %v376_v32 = vmul.f32 %v344_v2, %v947_v63  ;;  %v313_v35 = vmul.f32 0.27155, %v615_v8 }
  0x5d   : > { %v191_v36 = vmul.f32 0.3139, %v1007_v3  ;;  %628 = verf.f32 %v256_v20  ;;  %407 = vst [vmem:[%s953_s17 + $0x68] sm:$0xff] %v375_v28  ;;  %v314_v13 = vmul.f32 0.27155, %v617_v31 }
  0x5e   : > { %v192_v38 = vmul.f32 0.3139, %v1012_v6  ;;  %630 = verf.f32 %v257_v30  ;;  %v258_v58 = vmul.f32 0.70710677, %v1026_v21  ;;  %408 = vst [vmem:[%s953_s17 + $0x70] sm:$0xff] %v376_v32  ;;  %v345_v39 = vadd.f32 %v313_v35, %v217_v15 }
  0x5f   : > { %v221_v40 = vadd.f32 0.27155, %v189_v45  ;;  %v193_v63 = vmul.f32 0.3139, %v1015_v7  ;;  %v259_v14 = vmul.f32 0.70710677, %v1029_v27  ;;  %v346_v42 = vadd.f32 %v314_v13, %v218_v18 }
  0x60   : > { %v619_v41 = vpop.eup %618  ;;  %v222_v44 = vadd.f32 0.27155, %v190_v9  ;;  %632 = verf.f32 %v258_v58  ;;  %v260_v46 = vmul.f32 0.70710677, %v1037_v37  ;;  %v377_v22 = vmul.f32 %v345_v39, %v965_v25 }
  0x61   : > { %v621_v50 = vpop.eup %620  ;;  %v315_v51 = vmul.f32 0.27155, %v619_v41  ;;  %v223_v49 = vadd.f32 0.27155, %v191_v36  ;;  %634 = verf.f32 %v259_v14  ;;  %v378_v23 = vmul.f32 %v346_v42, %v968_v26 }
  0x62   : > { %v316_v53 = vmul.f32 0.27155, %v621_v50  ;;  %v224_v24 = vadd.f32 0.27155, %v192_v38  ;;  %636 = verf.f32 %v260_v46  ;;  %v623_v57 = vpop.eup %622  ;;  %409 = vst [vmem:[%s953_s17 + $0x78] sm:$0xff] %v377_v22 }
  0x63   : > { %v347_v59 = vadd.f32 %v315_v51, %v219_v19  ;;  %v225_v60 = vadd.f32 0.27155, %v193_v63  ;;  %v194_v25 = vmul.f32 0.3139, %v1026_v21  ;;  %v261_v61 = vmul.f32 0.70710677, %v1047_v47 }
  0x64   : > { %v625_v62 = vpop.eup %624  ;;  %410 = vst [vmem:[%s953_s17 + $0x80] sm:$0xff] %v378_v23  ;;  %v348_v4 = vadd.f32 %v316_v53, %v220_v29  ;;  %v317_v5 = vmul.f32 0.27155, %v623_v57  ;;  %v195_v26 = vmul.f32 0.3139, %v1029_v27  ;;  %v1076_v29 = vld [vmem:[%s871_s30 + $0xf8] sm:$0xff] }
  0x65   : > { %v262_v33 = vmul.f32 0.70710677, %v1051_v52  ;;  %v627_v0 = vpop.eup %626  ;;  %v379_v34 = vmul.f32 %v347_v59, %v982_v43  ;;  %v318_v10 = vmul.f32 0.27155, %v625_v62  ;;  %v196_v11 = vmul.f32 0.3139, %v1037_v37 }
  0x66   : > { %638 = verf.f32 %v261_v61  ;;  %v380_v1 = vmul.f32 %v348_v4, %v986_v48  ;;  %v349_v15 = vadd.f32 %v317_v5, %v221_v40  ;;  %v319_v16 = vmul.f32 0.27155, %v627_v0 }
  0x67   : > { %640 = verf.f32 %v262_v33  ;;  %v629_v17 = vpop.eup %628  ;;  %411 = vst [vmem:[%s953_s17 + $0x88] sm:$0xff] %v379_v34  ;;  %v350_v18 = vadd.f32 %v318_v10, %v222_v44  ;;  %v226_v19 = vadd.f32 0.27155, %v194_v25  ;;  %v197_v43 = vmul.f32 0.3139, %v1047_v47 }
  0x68   : > { %v263_v2 = vmul.f32 0.70710677, %v1055_v56  ;;  %v631_v45 = vpop.eup %630  ;;  %412 = vst [vmem:[%s953_s17 + $0x90] sm:$0xff] %v380_v1  ;;  %v381_v20 = vmul.f32 %v349_v15, %v994_v54  ;;  %v351_v8 = vadd.f32 %v319_v16, %v223_v49  ;;  %v320_v48 = vmul.f32 0.27155, %v629_v17 }
  0x69   : > { %v264_v28 = vmul.f32 0.70710677, %v1066_v12  ;;  %v382_v9 = vmul.f32 %v350_v18, %v997_v55  ;;  %v321_v30 = vmul.f32 0.27155, %v631_v45  ;;  %v227_v31 = vadd.f32 0.27155, %v195_v26 }
  0x6a   : > { %642 = verf.f32 %v263_v2  ;;  %v633_v32 = vpop.eup %632  ;;  %413 = vst [vmem:[%s953_s17 + $0x98] sm:$0xff] %v381_v20  ;;  %v383_v35 = vmul.f32 %v351_v8, %v1007_v3  ;;  %v352_v36 = vadd.f32 %v320_v48, %v224_v24  ;;  %v228_v13 = vadd.f32 0.27155, %v196_v11 }
  0x6b   : > { %644 = verf.f32 %v264_v28  ;;  %v635_v54 = vpop.eup %634  ;;  %414 = vst [vmem:[%s953_s17 + $0xa0] sm:$0xff] %v382_v9  ;;  %v353_v38 = vadd.f32 %v321_v30, %v225_v60  ;;  %v322_v58 = vmul.f32 0.27155, %v633_v32  ;;  %v198_v39 = vmul.f32 0.3139, %v1051_v52 }
  0x6c   : > { %v265_v55 = vmul.f32 0.70710677, %v1076_v29  ;;  %v637_v40 = vpop.eup %636  ;;  %415 = vst [vmem:[%s953_s17 + $0xa8] sm:$0xff] %v383_v35  ;;  %v384_v63 = vmul.f32 %v352_v36, %v1012_v6  ;;  %v323_v14 = vmul.f32 0.27155, %v635_v54 }
  0x6d   : > { %v385_v3 = vmul.f32 %v353_v38, %v1015_v7  ;;  %v354_v41 = vadd.f32 %v322_v58, %v226_v19  ;;  %v324_v42 = vmul.f32 0.27155, %v637_v40  ;;  %v229_v46 = vadd.f32 0.27155, %v197_v43 }
  0x6e   : > { %646 = verf.f32 %v265_v55  ;;  %416 = vst [vmem:[%s953_s17 + $0xb0] sm:$0xff] %v384_v63  ;;  %v355_v44 = vadd.f32 %v323_v14, %v227_v31  ;;  %v199_v50 = vmul.f32 0.3139, %v1055_v56  ;;  %v230_v6 = vadd.f32 0.27155, %v198_v39 }
  0x6f   : > { %417 = vst [vmem:[%s953_s17 + $0xb8] sm:$0xff] %v385_v3  ;;  %v386_v51 = vmul.f32 %v354_v41, %v1026_v21  ;;  %v356_v49 = vadd.f32 %v324_v42, %v228_v13  ;;  %v200_v23 = vmul.f32 0.3139, %v1066_v12  ;;  %v201_v61 = vmul.f32 0.3139, %v1076_v29 }
  0x70   : > { %v639_v22 = vpop.eup %638  ;;  %v387_v53 = vmul.f32 %v355_v44, %v1029_v27  ;;  %v231_v25 = vadd.f32 0.27155, %v199_v50 }
  0x71   : > { %v641_v7 = vpop.eup %640  ;;  %v325_v24 = vmul.f32 0.27155, %v639_v22  ;;  %418 = vst [vmem:[%s953_s17 + $0xc0] sm:$0xff] %v386_v51  ;;  %v388_v57 = vmul.f32 %v356_v49, %v1037_v37  ;;  %v232_v4 = vadd.f32 0.27155, %v200_v23 }
  0x72   : > { %v326_v59 = vmul.f32 0.27155, %v641_v7  ;;  %419 = vst [vmem:[%s953_s17 + $0xc8] sm:$0xff] %v387_v53  ;;  %v233_v34 = vadd.f32 0.27155, %v201_v61 }
  0x73   : > { %v357_v60 = vadd.f32 %v325_v24, %v229_v46  ;;  %420 = vst [vmem:[%s953_s17 + $0xd0] sm:$0xff] %v388_v57 }
  0x74   : > { %v643_v21 = vpop.eup %642  ;;  %v358_v62 = vadd.f32 %v326_v59, %v230_v6 }
  0x75   : > { %v645_v5 = vpop.eup %644  ;;  %v389_v27 = vmul.f32 %v357_v60, %v1047_v47  ;;  %v327_v26 = vmul.f32 0.27155, %v643_v21 }
  0x76   : > { %v390_v37 = vmul.f32 %v358_v62, %v1051_v52  ;;  %v328_v33 = vmul.f32 0.27155, %v645_v5 }
  0x77   : > { %421 = vst [vmem:[%s953_s17 + $0xd8] sm:$0xff] %v389_v27  ;;  %v359_v0 = vadd.f32 %v327_v26, %v231_v25 }
  0x78   : > { %v647_v10 = vpop.eup %646  ;;  %422 = vst [vmem:[%s953_s17 + $0xe0] sm:$0xff] %v390_v37  ;;  %v360_v11 = vadd.f32 %v328_v33, %v232_v4 }
  0x79   : > { %v391_v1 = vmul.f32 %v359_v0, %v1055_v56  ;;  %v329_v15 = vmul.f32 0.27155, %v647_v10 }
  0x7a   : > { %v392_v47 = vmul.f32 %v360_v11, %v1066_v12 }
  0x7b   : > { %423 = vst [vmem:[%s953_s17 + $0xe8] sm:$0xff] %v391_v1  ;;  %v361_v16 = vadd.f32 %v329_v15, %v233_v34 }
  0x7c   : > { %424 = vst [vmem:[%s953_s17 + $0xf0] sm:$0xff] %v392_v47 }
  0x7d   : > { %v393_v52 = vmul.f32 %v361_v16, %v1076_v29 }
  0x7f   : > { %425 = vst [vmem:[%s953_s17 + $0xf8] sm:$0xff] %v393_v52 }
  0x80   : > { %691 = shalt.err (!%p688_p1)
}
  0x81   : > { %s692_s13 = scalar_lea.hbm %s1111_s2, 4096  ;;  %s696_s20 = scalar_lea.hbm %s1159_s1, 16384 }
  0x82   : > { %p693_p3 = scmp.ne.s32.totalorder %s1111_s2, %s692_s13  ;;  %p697_p0 = scmp.lt.u32.totalorder %s1111_s2, %s1159_s1 }
  0x83   : > { %p698_p2 = scmp.lt.u32.totalorder %s696_s20, %s692_s13  ;;  %p700_p6 = scmp.lt.u32.totalorder %s692_s13, %s1111_s2 }
  0x84   : > { %p694_p4 = pnand %p693_p3, %p1166_p10 }
  0x85   : > { %p699_p7 = por %p698_p2, %p697_p0 }
  0x86   : > { %p695_p5 = pneg %p694_p4 }
  0x87   : > { %p701_p11 = por %p700_p6, %p699_p7 }
  0x89   : > { %p702_p12 = pnand %p701_p11, %p695_p5 }
  0x8b   : > { %705 = shalt.err (!%p702_p12)
}
  0x8c   : > { %s750_s24 = smov 2048   ;;  %s751_s26 = smov 128  }
  0x8d   : > { %536 = dma.vmem_to_hbm [thread:$0]  (%p1166_p10), %s1113_s27, 4096, %s1111_s2, %s427_s10, %s750_s24, %s750_s24, %s751_s26  }
  0x8e PF: > { %p547_p8 = scmp.ge.s32.totalorder %s744_s9, 2  ;;  %s456_s30 = sand.u32 1, %s732_s6  }
  0x8f   : > { %p1167_p9 = scmp.ne.s32.totalorder %s1164_s19, 0  ;;  %s457_s17 = scalar_lea.sflag [#allocation4], %s456_s30 }
  0x91   : > { %p543_p13 = pnand %p547_p8, %p1167_p9 }
  0x93   : > { %727 = dma.done.wait (!%p543_p13), %s457_s17, 4096  }
  0x94   : > { %729 = vsyncadd (!%p543_p13), %s457_s17, 4294963200  ;;  %p14_p1 = scmp.ge.s32.totalorder %s787_s12, 6   ;;  %s1168_s6 = smov %s736_s7 }
  0x95   : > { %s1169_s7 = smov %s740_s8  ;;  %s1170_s8 = smov %s799_s15 }
  0x96   : > { %s1171_s9 = smov %s787_s12  ;;  %16 = sbr.rel (!%p14_p1) target bundleno = 5 (0x5), region = 69 }
  0x9d   :  { %462 = vsyncpa [#allocation3], 1 }
  0x9e   :  { %464 = vsyncpa [#allocation3 + $0x1], 1 }
  0x9f   :  { %465 = vsyncpa [#allocation4], 1 }
  0xa0   :  { %467 = vsyncpa [#allocation4 + $0x1], 1 }

</bundles_post_ra>
